<compile_context>
chip_gen: v7x
topology: tpu7x:2x2x1
jax: 0.10.0
libtpu: 0.0.40
codegen_flags: <defaults>
</compile_context>

<pallas_src>
import functools

import jax
import jax.numpy as jnp
from jax.experimental import pallas as pl
from jax.experimental.pallas import tpu as pltpu

_SQRT_HALF = 0.7071067811865476


def _round_up(x, m):
    return (x + m - 1) // m * m


def _choose_th(H, th_max):
    """Largest hidden tile (multiple of 128) <= th_max that divides H; else pad."""
    th_max = max(128, min(_round_up(th_max, 128), _round_up(H, 128)))
    for cand in range(th_max, 0, -128):
        if H % cand == 0:
            return cand, H
    return th_max, _round_up(H, th_max)


def _ffn_kernel(x_ref, w1_ref, b1_ref, w2_ref, b2_ref, o_ref, *scratch,
                precision=None):
    """One (tm, D) output tile; grid axis 1 tiles the hidden (reduction) dim."""
    # f32 output: accumulate directly into the resident output tile (no scratch).
    acc_ref = scratch[0] if scratch else o_ref
    k = pl.program_id(1)

    @pl.when(k == 0)
    def _init():
        acc_ref[...] = jnp.zeros_like(acc_ref)

    # (tm, D) @ (D, th) on the MXU, f32 accumulation.
    h = jnp.dot(x_ref[...], w1_ref[...],
                preferred_element_type=jnp.float32, precision=precision)
    h = h + b1_ref[...]
    # Exact (erf) GELU, matching torch.nn.GELU() default; kept in f32.
    h = 0.5 * h * (1.0 + jax.lax.erf(h * _SQRT_HALF))
    # (tm, th) @ (th, D) accumulated in VMEM — the hidden activation never
    # round-trips through HBM.
    acc_ref[...] += jnp.dot(h.astype(w2_ref.dtype), w2_ref[...],
                            preferred_element_type=jnp.float32,
                            precision=precision)

    @pl.when(k == pl.num_programs(1) - 1)
    def _finalize():
        o_ref[...] = (acc_ref[...] + b2_ref[...]).astype(o_ref.dtype)


def prepare_ffn_params(w1, b1, w2, b2, *, th=512, compute_dtype=jnp.bfloat16):
    """One-time weight preparation (cast + optional hidden-dim pad).

    Hoisted out of the per-forward path so weights are NOT re-cast / re-padded
    on every call (that was a full extra HBM read+write pass per forward).
    """
    D, H = w1.shape
    assert w2.shape == (H, D), (w2.shape, (H, D))
    assert b1.shape == (H,) and b2.shape == (D,), (b1.shape, b2.shape)
    th, Hp = _choose_th(H, th)
    if Hp != H:
        # Padded hidden columns: GELU(0 + 0) = 0 multiplied into zero rows of w2.
        w1 = jnp.pad(w1, ((0, 0), (0, Hp - H)))
        b1 = jnp.pad(b1, ((0, Hp - H),))
        w2 = jnp.pad(w2, ((0, Hp - H), (0, 0)))
    return {
        "w1": jnp.asarray(w1, compute_dtype),
        "b1": jnp.asarray(b1, jnp.float32).reshape(1, Hp),
        "w2": jnp.asarray(w2, compute_dtype),
        "b2": jnp.asarray(b2, jnp.float32).reshape(1, D),
        "th": int(th),
        "dim": int(D),
        "hidden": int(H),
        "compute_dtype": jnp.dtype(compute_dtype),
    }


def feedforward_pallas(x, params, *, tm=512, out_dtype=None,
                       vmem_limit_bytes=None, precision=None):
    """y = GELU(x @ w1 + b1) @ w2 + b2 over the last axis of x.

    The two Dropout(p=0.0) layers of the torch module are identity and omitted.
    """
    w1, b1, w2, b2 = params["w1"], params["b1"], params["w2"], params["b2"]
    th = params["th"]
    D = params["dim"]
    compute_dtype = params["compute_dtype"]
    Hp = w1.shape[1]

    orig_shape = x.shape
    assert orig_shape[-1] == D, (orig_shape, D)
    if out_dtype is None:
        out_dtype = x.dtype
    out_dtype = jnp.dtype(out_dtype)

    x2 = x.reshape(-1, D).astype(compute_dtype)
    M = x2.shape[0]

    # bf16 packs 16 sublanes per vreg -> keep tm a multiple of 16 in bf16 mode.
    mult = 16 if compute_dtype == jnp.dtype(jnp.bfloat16) else 8
    tm = max(mult, min(tm, _round_up(M, mult)))
    # Guarantee >= 2 token tiles so the "parallel" axis shards across both TCs
    # on v7x instead of leaving one core idle for small-batch shapes.
    if pl.cdiv(M, tm) < 2 and M > mult:
        tm = _round_up(pl.cdiv(M, 2), mult)
    Mp = _round_up(M, tm)
    if Mp != M:
        x2 = jnp.pad(x2, ((0, Mp - M), (0, 0)))

    grid = (Mp // tm, Hp // th)

    # f32 output: accumulate in place in o_ref; scratch only for narrower outputs.
    use_scratch = out_dtype != jnp.dtype(jnp.float32)
    scratch_shapes = [pltpu.VMEM((tm, D), jnp.float32)] if use_scratch else []

    c_item = compute_dtype.itemsize
    o_item = out_dtype.itemsize
    if vmem_limit_bytes is None:
        # Double-buffered x / w1 / w2 / biases / out tiles (+ optional f32 acc)
        # plus a few MiB of compiler scratch headroom; clamped to sane bounds.
        footprint = 2 * (tm * D * c_item + D * th * c_item + th * D * c_item
                         + th * 4 + D * 4 + tm * D * o_item)
        if use_scratch:
            footprint += tm * D * 4
        vmem_limit_bytes = min(max(footprint + 4 * 1024 * 1024,
                                   32 * 1024 * 1024),
                               100 * 1024 * 1024)

    n_tok_tiles = Mp // tm
    cost = pl.CostEstimate(
        flops=4 * M * D * params["hidden"],          # two matmuls
        transcendentals=M * Hp,                      # one erf per hidden activation
        bytes_accessed=(Mp * D * c_item                       # x
                        + n_tok_tiles * 2 * D * Hp * c_item   # w1/w2 per token tile
                        + (Hp + D) * 4                        # biases
                        + Mp * D * o_item),                   # output
    )

    kernel = functools.partial(_ffn_kernel, precision=precision)

    y = pl.pallas_call(
        kernel,
        out_shape=jax.ShapeDtypeStruct((Mp, D), out_dtype),
        grid_spec=pltpu.PrefetchScalarGridSpec(
            num_scalar_prefetch=0,
            grid=grid,
            in_specs=[
                pl.BlockSpec((tm, D), lambda i, k: (i, 0)),   # x (resident over k)
                pl.BlockSpec((D, th), lambda i, k: (0, k)),   # w1 tile
                pl.BlockSpec((1, th), lambda i, k: (0, k)),   # b1 tile
                pl.BlockSpec((th, D), lambda i, k: (k, 0)),   # w2 tile
                pl.BlockSpec((1, D), lambda i, k: (0, 0)),    # b2 (resident)
            ],
            out_specs=pl.BlockSpec((tm, D), lambda i, k: (i, 0)),
            scratch_shapes=scratch_shapes,
        ),
        compiler_params=pltpu.CompilerParams(
            dimension_semantics=("parallel", "arbitrary"),
            vmem_limit_bytes=int(vmem_limit_bytes),
        ),
        cost_estimate=cost,
    )(x2, w1, b1, w2, b2)

    if Mp != M:
        y = y[:M]
    return y.reshape(orig_shape[:-1] + (D,))


if __name__ == "__main__":
    # Small shapes consistent with FeedForward(dim, hidden_dim):
    # tokens (B, N, dim) with dim=128, hidden_dim=512.
    B, N, DIM, HIDDEN = 2, 128, 128, 512
    key = jax.random.PRNGKey(0)
    kx, k1, k2, k3, k4 = jax.random.split(key, 5)
    x = jax.random.normal(kx, (B, N, DIM), jnp.float32)
    w1 = jax.random.normal(k1, (DIM, HIDDEN), jnp.float32) * (DIM ** -0.5)
    b1 = 0.02 * jax.random.normal(k2, (HIDDEN,), jnp.float32)
    w2 = jax.random.normal(k3, (HIDDEN, DIM), jnp.float32) * (HIDDEN ** -0.5)
    b2 = 0.02 * jax.random.normal(k4, (DIM,), jnp.float32)

    # Pure-JAX reference: Linear -> exact GELU -> Linear (Dropout(p=0) = identity).
    hi = jax.lax.Precision.HIGHEST
    ref = jnp.dot(
        jax.nn.gelu(jnp.dot(x, w1, precision=hi) + b1, approximate=False),
        w2, precision=hi) + b2

    # Performance mode (default): bf16 MXU inputs, f32 accumulation; weights are
    # cast/padded ONCE outside the jitted forward, th=256 -> reduction grid of 2.
    params_bf16 = prepare_ffn_params(w1, b1, w2, b2, th=256,
                                     compute_dtype=jnp.bfloat16)
    fwd_bf16 = jax.jit(lambda t: feedforward_pallas(t, params_bf16))
    y16 = jax.block_until_ready(fwd_bf16(x))
    assert y16.shape == ref.shape, (y16.shape, ref.shape)
    assert bool(jnp.all(jnp.isfinite(y16)))
    err_bf16 = float(jnp.max(jnp.abs(y16.astype(jnp.float32) - ref)))
    assert err_bf16 < 2e-1, err_bf16

    # Numerics-parity mode: f32 MXU inputs (tolerance absorbs MXU pass decomposition).
    params_f32 = prepare_ffn_params(w1, b1, w2, b2, th=256,
                                    compute_dtype=jnp.float32)
    fwd_f32 = jax.jit(lambda t: feedforward_pallas(t, params_f32))
    y32 = jax.block_until_ready(fwd_f32(x))
    assert bool(jnp.all(jnp.isfinite(y32)))
    err_f32 = float(jnp.max(jnp.abs(y32 - ref)))
    assert err_f32 < 5e-2, err_f32

    # bf16-output path (exercises the f32 scratch accumulator + final-cast branch).
    fwd_bf16_out = jax.jit(lambda t: feedforward_pallas(
        t, params_bf16, out_dtype=jnp.bfloat16))
    yb = jax.block_until_ready(fwd_bf16_out(x))
    assert bool(jnp.all(jnp.isfinite(yb.astype(jnp.float32))))
    err_bf16_out = float(jnp.max(jnp.abs(yb.astype(jnp.float32) - ref)))
    assert err_bf16_out < 3e-1, err_bf16_out

    print("KERNEL_OK")
</pallas_src>

<mosaic_0001>
module attributes {stable_mosaic.version = 11 : i64} {
  func.func @_ffn_kernel(%arg0: i32, %arg1: i32, %arg2: memref<128x128xbf16, #tpu.memory_space<vmem>>, %arg3: memref<128x256xbf16, #tpu.memory_space<vmem>>, %arg4: memref<1x256xf32, #tpu.memory_space<vmem>>, %arg5: memref<256x128xbf16, #tpu.memory_space<vmem>>, %arg6: memref<1x128xf32, #tpu.memory_space<vmem>>, %arg7: memref<128x128xf32, #tpu.memory_space<vmem>>) attributes {dimension_semantics = [#tpu.dimension_semantics<parallel>, #tpu.dimension_semantics<arbitrary>], iteration_bounds = array<i64: 2, 2>, scalar_prefetch = 0 : i64, scratch_operands = 0 : i64, tpu.core_type = #tpu.core_type<tc>, window_params = [{transform_indices = @transform_0, window_bounds = array<i64: 128, 128>}, {transform_indices = @transform_1, window_bounds = array<i64: 128, 256>}, {transform_indices = @transform_2, window_bounds = array<i64: 1, 256>}, {transform_indices = @transform_3, window_bounds = array<i64: 256, 128>}, {pipeline_mode = #tpu.pipeline_mode<synchronous>, transform_indices = @transform_4, window_bounds = array<i64: 1, 128>}, {transform_indices = @transform_5, window_bounds = array<i64: 128, 128>}]} {
    %c0_i32 = arith.constant 0 : i32
    %0 = arith.cmpi eq, %arg1, %c0_i32 : i32
    %1 = arith.extui %0 : i1 to i32
    %c0_i32_0 = arith.constant 0 : i32
    %2 = arith.cmpi ne, %1, %c0_i32_0 : i32
    scf.if %2 {
      %cst_17 = arith.constant 0.000000e+00 : f32
      %26 = vector.broadcast %cst_17 : f32 to vector<128x128xf32>
      %c0_18 = arith.constant 0 : index
      %c0_19 = arith.constant 0 : index
      %27 = vector.load %arg7[%c0_18, %c0_19] : memref<128x128xf32, #tpu.memory_space<vmem>>, vector<128x128xf32>
      tpu.vector_store %arg7[%c0_18, %c0_19], %26 {strides = array<i32>} : memref<128x128xf32, #tpu.memory_space<vmem>>, vector<128x128xf32>,
    } else {
    }
    %c0 = arith.constant 0 : index
    %c0_1 = arith.constant 0 : index
    %3 = vector.load %arg2[%c0, %c0_1] : memref<128x128xbf16, #tpu.memory_space<vmem>>, vector<128x128xbf16>
    %c0_2 = arith.constant 0 : index
    %c0_3 = arith.constant 0 : index
    %4 = vector.load %arg3[%c0_2, %c0_3] : memref<128x256xbf16, #tpu.memory_space<vmem>>, vector<128x256xbf16>
    %cst = arith.constant dense<0.000000e+00> : vector<128x256xf32>
    %5 = tpu.matmul %3, %4, %cst {dimension_numbers = #tpu.dot_dimension_numbers<[1], [0], [0], [1], [0, 0, 1, 1], [], []>} : vector<128x128xbf16>, vector<128x256xbf16>, vector<128x256xf32> -> vector<128x256xf32>
    %c0_4 = arith.constant 0 : index
    %c0_5 = arith.constant 0 : index
    %6 = vector.load %arg4[%c0_4, %c0_5] : memref<1x256xf32, #tpu.memory_space<vmem>>, vector<1x256xf32>
    %7 = vector.broadcast %6 : vector<1x256xf32> to vector<128x256xf32>
    %8 = arith.addf %5, %7 : vector<128x256xf32>
    %cst_6 = arith.constant 5.000000e-01 : f32
    %9 = vector.broadcast %cst_6 : f32 to vector<128x256xf32>
    %10 = arith.mulf %9, %8 : vector<128x256xf32>
    %cst_7 = arith.constant 0.707106769 : f32
    %11 = vector.broadcast %cst_7 : f32 to vector<128x256xf32>
    %12 = arith.mulf %8, %11 : vector<128x256xf32>
    %13 = math.erf %12 : vector<128x256xf32>
    %cst_8 = arith.constant 1.000000e+00 : f32
    %14 = vector.broadcast %cst_8 : f32 to vector<128x256xf32>
    %15 = arith.addf %14, %13 : vector<128x256xf32>
    %16 = arith.mulf %10, %15 : vector<128x256xf32>
    %c0_9 = arith.constant 0 : index
    %c0_10 = arith.constant 0 : index
    %17 = vector.load %arg7[%c0_9, %c0_10] : memref<128x128xf32, #tpu.memory_space<vmem>>, vector<128x128xf32>
    %18 = arith.truncf %16 : vector<128x256xf32> to vector<128x256xbf16>
    %c0_11 = arith.constant 0 : index
    %c0_12 = arith.constant 0 : index
    %19 = vector.load %arg5[%c0_11, %c0_12] : memref<256x128xbf16, #tpu.memory_space<vmem>>, vector<256x128xbf16>
    %cst_13 = arith.constant dense<0.000000e+00> : vector<128x128xf32>
    %20 = tpu.matmul %18, %19, %cst_13 {dimension_numbers = #tpu.dot_dimension_numbers<[1], [0], [0], [1], [0, 0, 1, 1], [], []>} : vector<128x256xbf16>, vector<256x128xbf16>, vector<128x128xf32> -> vector<128x128xf32>
    %21 = arith.addf %17, %20 : vector<128x128xf32>
    %c0_14 = arith.constant 0 : index
    %c0_15 = arith.constant 0 : index
    %22 = vector.load %arg7[%c0_14, %c0_15] : memref<128x128xf32, #tpu.memory_space<vmem>>, vector<128x128xf32>
    tpu.vector_store %arg7[%c0_14, %c0_15], %21 {strides = array<i32>} : memref<128x128xf32, #tpu.memory_space<vmem>>, vector<128x128xf32>,
    %c1_i32 = arith.constant 1 : i32
    %23 = arith.cmpi eq, %arg1, %c1_i32 : i32
    %24 = arith.extui %23 : i1 to i32
    %c0_i32_16 = arith.constant 0 : i32
    %25 = arith.cmpi ne, %24, %c0_i32_16 : i32
    scf.if %25 {
      %c0_17 = arith.constant 0 : index
      %c0_18 = arith.constant 0 : index
      %26 = vector.load %arg7[%c0_17, %c0_18] : memref<128x128xf32, #tpu.memory_space<vmem>>, vector<128x128xf32>
      %c0_19 = arith.constant 0 : index
      %c0_20 = arith.constant 0 : index
      %27 = vector.load %arg6[%c0_19, %c0_20] : memref<1x128xf32, #tpu.memory_space<vmem>>, vector<1x128xf32>
      %28 = vector.broadcast %27 : vector<1x128xf32> to vector<128x128xf32>
      %29 = arith.addf %26, %28 : vector<128x128xf32>
      %c0_21 = arith.constant 0 : index
      %c0_22 = arith.constant 0 : index
      %30 = vector.load %arg7[%c0_21, %c0_22] : memref<128x128xf32, #tpu.memory_space<vmem>>, vector<128x128xf32>
      tpu.vector_store %arg7[%c0_21, %c0_22], %29 {strides = array<i32>} : memref<128x128xf32, #tpu.memory_space<vmem>>, vector<128x128xf32>,
    } else {
    }
    return
  }
  func.func @transform_0(%arg0: i32, %arg1: i32) -> (i32, i32) {
    %c0_i32 = arith.constant 0 : i32
    %c0_i32_0 = arith.constant 0 : i32
    return %arg0, %c0_i32 : i32, i32
  }
  func.func @transform_1(%arg0: i32, %arg1: i32) -> (i32, i32) {
    %c0_i32 = arith.constant 0 : i32
    %c0_i32_0 = arith.constant 0 : i32
    return %c0_i32, %arg1 : i32, i32
  }
  func.func @transform_2(%arg0: i32, %arg1: i32) -> (i32, i32) {
    %c0_i32 = arith.constant 0 : i32
    %c0_i32_0 = arith.constant 0 : i32
    return %c0_i32, %arg1 : i32, i32
  }
  func.func @transform_3(%arg0: i32, %arg1: i32) -> (i32, i32) {
    %c0_i32 = arith.constant 0 : i32
    %c0_i32_0 = arith.constant 0 : i32
    return %arg1, %c0_i32 : i32, i32
  }
  func.func @transform_4(%arg0: i32, %arg1: i32) -> (i32, i32) {
    %c0_i32 = arith.constant 0 : i32
    %c0_i32_0 = arith.constant 0 : i32
    %c0_i32_1 = arith.constant 0 : i32
    return %c0_i32, %c0_i32_0 : i32, i32
  }
  func.func @transform_5(%arg0: i32, %arg1: i32) -> (i32, i32) {
    %c0_i32 = arith.constant 0 : i32
    %c0_i32_0 = arith.constant 0 : i32
    return %arg0, %c0_i32 : i32, i32
  }
}

</mosaic_0001>

<bundles_post_ra>
// kernel: _lambda_.1
= control target key start
LH: loop header
LB: loop body
LE: loop exit
PB: predicated region body
PF: predicated region fallthrough
CT: control target
= control target key end

     0   :  { %s2250_s0 = inlined_call_operand.vmem [shape: bf16[256,128], index: 0, kind: input, shape index: {}]   ;;  %s2251_s1 = inlined_call_operand.vmem [shape: bf16[128,512], index: 1, kind: input, shape index: {}]   ;;  %s2252_s2 = inlined_call_operand.vmem [shape: f32[1,512], index: 2, kind: input, shape index: {}]   ;;  %s2253_s3 = inlined_call_operand.vmem [shape: bf16[512,128], index: 3, kind: input, shape index: {}]   ;;  %s2254_s4 = inlined_call_operand.vmem [shape: f32[1,128], index: 4, kind: input, shape index: {}]   ;;  %s2255_s5 = inlined_call_operand.hbm [shape: f32[256,128], index: 5, kind: output, shape index: {}]  }
   0x1   :  { %2262 = sst [smem:[#allocation12_spill]] %s2251_s1 }
   0x2   :  { %10 = vsyncpa [#allocation4], 0 }
   0x3   :  { %12 = vsyncpa [#allocation4 + $0x1], 0  ;;  %s1814_s18 = smov 0   ;;  %s1816_s19 = smov 0  }
   0x4   :  { %s1818_s20 = smov 0   ;;  %s1820_s21 = smov 0  }
   0x5   :  { %s1822_s22 = smov 0   ;;  %s1824_s23 = smov 0  }
   0x6   :  { %s1826_s24 = smov 0   ;;  %s1828_s25 = smov 0  }
   0x7   :  { %s1830_s26 = smov 0   ;;  %s1832_s27 = smov 0  }
   0x8 LB: > { %2263 = sst [smem:[#allocation6_spill]] %s1757_s22  ;;  %s1335_s28 = sadd.s32 4294967295, %s1777_s27   ;;  %s1777_s27 = sphi %s1832_s27, %s18_s27   ;;  %s1773_s26 = sphi %s1830_s26, %s2279_s26   ;;  %s1769_s25 = sphi %s1828_s25, %s2278_s25   ;;  %s1765_s24 = sphi %s1826_s24, %s2277_s24   ;;  %s1761_s23 = sphi %s1824_s23, %s2276_s23   ;;  %s1757_s22 = sphi %s1822_s22, %s2275_s22   ;;  %s1753_s21 = sphi %s1820_s21, %s2274_s21   ;;  %s1749_s20 = sphi %s1818_s20, %s2282_s20   ;;  %s1745_s19 = sphi %s1816_s19, %s2281_s19   ;;  %s1741_s18 = sphi %s1814_s18, %s2280_s18  }
   0x9   : > { %2264 = sst [smem:[#allocation7_spill]] %s1769_s25  ;;  %s1336_s29 = sadd.s32 4294967294, %s1777_s27  }
   0xa   : > { %2265 = sst [smem:[#allocation8_spill]] %s1773_s26  ;;  %s27_s30 = sadd.s32 1, %s1769_s25 }
   0xb   : > { %s30_s6 = sadd.s32 1, %s1773_s26  ;;  %p28_p0 = scmp.ge.s32.totalorder %s27_s30, 2 }
   0xc   : > { %s63_s7 = sadd.s32 1, %s1757_s22  ;;  %p70_p1 = scmp.ne.s32.totalorder %s1757_s22, %s1753_s21 }
   0xd   : > { %p71_p2 = scmp.eq.s32.totalorder %s1777_s27, 0  ;;  %s2284_s30 = smov (%p28_p0, %s27_s30), 0 }
   0xe   : > { %2266 = sst [smem:[#allocation9_spill]] %s2284_s30  ;;  %s2286_s6 = smov (!%p28_p0, %s30_s6), %s1773_s26 }
   0xf   : > { %s60_s8 = ssub.s32 %s1769_s25, %s2284_s30  ;;  %p1877_p3 = por %p71_p2, %p70_p1 }
  0x10   : > { %p32_p4 = scmp.ge.s32.totalorder %s2286_s6, 2  ;;  %p61_p5 = scmp.eq.s32.totalorder %s60_s8, 0 }
  0x11   : > { %s162_s10 = sadd.s32 1, %s1749_s20  ;;  %p172_p6 = scmp.ne.s32.totalorder %s1749_s20, %s1745_s19 }
  0x12   : > { %s2288_s6 = smov (%p32_p4, %s2286_s6), 0  ;;  %p173_p7 = scmp.eq.s32.totalorder %s1335_s28, 3 }
  0x13   : > { %2268 = sst [smem:[#allocation10_spill]] %s2288_s6  ;;  %s159_s12 = ssub.s32 %s1773_s26, %s2288_s6 }
  0x14   : > { %s1887_s11 = scalar_select %p61_p5, %s1757_s22, %s63_s7  }
  0x15   : > { %p160_p8 = scmp.eq.s32.totalorder %s159_s12, 0  ;;  %p178_p9 = scmp.ne.s32.totalorder %s1745_s19, %s1741_s18 }
  0x16   : > { %2269 = sst [smem:[#allocation11_spill]] %s1887_s11  ;;  %p1893_p10 = por %p173_p7, %p172_p6 }
  0x17   : > { %p179_p11 = scmp.eq.s32.totalorder %s1336_s29, 3  ;;  %p1338_p13 = scmp.ge.s32.totalorder %s1777_s27, 4 }
  0x18   : > { %s1898_s14 = scalar_select %p160_p8, %s1749_s20, %s162_s10  }
  0x19   : > { %p1900_p12 = por %p179_p11, %p178_p9  ;;  %198 = sbr.rel (%p1338_p13) target bundleno = 50 (0x32), region = 20 }
  0x20   : > { %210 = sbr.rel (!%p1877_p3) target bundleno = 50 (0x32), region = 28  ;;  %s212_s16 = sand.u32 (%p1877_p3), 1, %s1757_s22  }
  0x21   : > { %s1398_s17 = sshll.u32 (%p1877_p3), %s1769_s25, 3  ;;  %s1339_s28 = sshll.u32 (%p1877_p3), %s212_s16, 7 }
  0x22   : > { %s2272_s1 = sld [smem:[#allocation12_spill]] (%p1877_p3)  ;;  %s214_s9 = scalar_lea.vmem (%p1877_p3), [#allocation2], %s1339_s28 }
  0x28   : > { %s1912_s29 = scalar_lea.vmem %s2272_s1, %s1398_s17 }
  0x29   : > { %v275_v0 = vld [vmem:[%s1912_s29] sm:$0xff]  ;;  %v277_v1 = vld [vmem:[%s1912_s29 + $0x10] sm:$0xff] }
  0x2a   : > { %v279_v2 = vld [vmem:[%s1912_s29 + $0x20] sm:$0xff]  ;;  %276 = vst [vmem:[%s214_s9] sm:$0xff] %v275_v0  ;;  %278 = vst [vmem:[%s214_s9 + $0x8] sm:$0xff] %v277_v1  ;;  %v281_v3 = vld [vmem:[%s1912_s29 + $0x30] sm:$0xff] }
  0x2b   : > { %280 = vst [vmem:[%s214_s9 + $0x10] sm:$0xff] %v279_v2  ;;  %v283_v4 = vld [vmem:[%s1912_s29 + $0x40] sm:$0xff]  ;;  %v285_v5 = vld [vmem:[%s1912_s29 + $0x50] sm:$0xff]  ;;  %282 = vst [vmem:[%s214_s9 + $0x18] sm:$0xff] %v281_v3 }
  0x2c   : > { %284 = vst [vmem:[%s214_s9 + $0x20] sm:$0xff] %v283_v4  ;;  %286 = vst [vmem:[%s214_s9 + $0x28] sm:$0xff] %v285_v5  ;;  %v287_v6 = vld [vmem:[%s1912_s29 + $0x60] sm:$0xff]  ;;  %v289_v7 = vld [vmem:[%s1912_s29 + $0x70] sm:$0xff] }
  0x2d   : > { %v291_v8 = vld [vmem:[%s1912_s29 + $0x80] sm:$0xff]  ;;  %288 = vst [vmem:[%s214_s9 + $0x30] sm:$0xff] %v287_v6  ;;  %290 = vst [vmem:[%s214_s9 + $0x38] sm:$0xff] %v289_v7  ;;  %v293_v9 = vld [vmem:[%s1912_s29 + $0x90] sm:$0xff] }
  0x2e   : > { %292 = vst [vmem:[%s214_s9 + $0x40] sm:$0xff] %v291_v8  ;;  %v295_v10 = vld [vmem:[%s1912_s29 + $0xa0] sm:$0xff]  ;;  %v297_v11 = vld [vmem:[%s1912_s29 + $0xb0] sm:$0xff]  ;;  %294 = vst [vmem:[%s214_s9 + $0x48] sm:$0xff] %v293_v9 }
  0x2f   : > { %296 = vst [vmem:[%s214_s9 + $0x50] sm:$0xff] %v295_v10  ;;  %298 = vst [vmem:[%s214_s9 + $0x58] sm:$0xff] %v297_v11  ;;  %v299_v12 = vld [vmem:[%s1912_s29 + $0xc0] sm:$0xff]  ;;  %v301_v13 = vld [vmem:[%s1912_s29 + $0xd0] sm:$0xff] }
  0x30   : > { %v303_v14 = vld [vmem:[%s1912_s29 + $0xe0] sm:$0xff]  ;;  %300 = vst [vmem:[%s214_s9 + $0x60] sm:$0xff] %v299_v12  ;;  %302 = vst [vmem:[%s214_s9 + $0x68] sm:$0xff] %v301_v13  ;;  %v305_v15 = vld [vmem:[%s1912_s29 + $0xf0] sm:$0xff] }
  0x31   : > { %304 = vst [vmem:[%s214_s9 + $0x70] sm:$0xff] %v303_v14  ;;  %306 = vst [vmem:[%s214_s9 + $0x78] sm:$0xff] %v305_v15 }
  0x32 PF: > { %p1342_p0 = scmp.ge.s32.totalorder %s1777_s27, 1  ;;  %p328_p1 = scmp.lt.s32.totalorder %s1777_s27, 5 }
  0x34   : > { %p329_p2 = pnand %p1342_p0, %p328_p1 }
  0x35   : > { %s335_s10 = sand.u32 (!%p329_p2), 1, %s1753_s21   ;;  %s2257_s12 = sand.u32 (!%p329_p2), 1, %s1745_s19  }
  0x36   : > { %332 = sbr.rel (%p329_p2) target bundleno = 655 (0x28f), region = 74  ;;  %s1343_s16 = sshll.u32 (!%p329_p2), %s335_s10, 7 }
  0x37   : > { %s1344_s17 = sshll.u32 (!%p329_p2), %s2257_s12, 7  ;;  %s1345_s28 = sshll.u32 (!%p329_p2), %s1765_s24, 4 }
  0x38   : > { %s1347_s7 = sshll.u32 (!%p329_p2), %s1761_s23, 1  ;;  %p377_p3 = scmp.lt.s32.totalorder (!%p329_p2), %s1345_s28, 31 }
  0x39   : > { %p384_p4 = scmp.lt.s32.totalorder (!%p329_p2), %s1347_s7, 3  ;;  %s1348_s8 = sshll.u32 (!%p329_p2), %s1761_s23, 5 }
  0x3a   : > { %p389_p5 = scmp.lt.s32.totalorder (!%p329_p2), %s1348_s8, 63  ;;  %s1955_s22 = scalar_lea.vmem (!%p329_p2), [#allocation2], %s1343_s16 }
  0x3b   : > { %p1350_p6 = scmp.ne.s32.totalorder (!%p329_p2), %s1761_s23, 0 }
  0x3d   : > { %s2290_s28 = smov (!%p377_p3, %s1345_s28), 31  ;;  %s2292_s7 = smov (!%p384_p4, %s1347_s7), 3 }
  0x3e   : > { %s1346_s29 = sshll.u32 %s2290_s28, 2  ;;  %s386_s12 = scalar_lea.vmem %s2252_s2, %s2292_s7  ;;  %v1779_v16 = vmov (!%p1350_p6), 0.0  }
  0x3f   : > { %s1944_s6 = scalar_lea.vmem %s2250_s0, %s1346_s29  ;;  %s2294_s8 = smov (!%p389_p5, %s1348_s8), 63 }
  0x40   : > { %s1349_s30 = sshll.u32 %s2294_s8, 2  ;;  %s1957_s28 = scalar_lea.vmem [#allocation3], %s1344_s17 }
  0x41   : > { %s1953_s11 = scalar_lea.vmem %s2253_s3, %s1349_s30  ;;  %399 = sbr.rel (%p1350_p6) target bundleno = 73 (0x49), region = 82  ;;  %400 = vst [vmem:[%s1957_s28] sm:$0xff] (!%p1350_p6), %v1779_v16  ;;  %401 = vst [vmem:[%s1957_s28 + $0x8] sm:$0xff] (!%p1350_p6), %v1779_v16 }
  0x42   : > { %402 = vst [vmem:[%s1957_s28 + $0x10] sm:$0xff] (!%p1350_p6), %v1779_v16  ;;  %403 = vst [vmem:[%s1957_s28 + $0x18] sm:$0xff] (!%p1350_p6), %v1779_v16 }
  0x43   : > { %404 = vst [vmem:[%s1957_s28 + $0x20] sm:$0xff] (!%p1350_p6), %v1779_v16  ;;  %405 = vst [vmem:[%s1957_s28 + $0x28] sm:$0xff] (!%p1350_p6), %v1779_v16 }
  0x44   : > { %406 = vst [vmem:[%s1957_s28 + $0x30] sm:$0xff] (!%p1350_p6), %v1779_v16  ;;  %407 = vst [vmem:[%s1957_s28 + $0x38] sm:$0xff] (!%p1350_p6), %v1779_v16 }
  0x45   : > { %408 = vst [vmem:[%s1957_s28 + $0x40] sm:$0xff] (!%p1350_p6), %v1779_v16  ;;  %409 = vst [vmem:[%s1957_s28 + $0x48] sm:$0xff] (!%p1350_p6), %v1779_v16 }
  0x46   : > { %410 = vst [vmem:[%s1957_s28 + $0x50] sm:$0xff] (!%p1350_p6), %v1779_v16  ;;  %411 = vst [vmem:[%s1957_s28 + $0x58] sm:$0xff] (!%p1350_p6), %v1779_v16 }
  0x47   : > { %412 = vst [vmem:[%s1957_s28 + $0x60] sm:$0xff] (!%p1350_p6), %v1779_v16  ;;  %413 = vst [vmem:[%s1957_s28 + $0x68] sm:$0xff] (!%p1350_p6), %v1779_v16 }
  0x48   : > { %414 = vst [vmem:[%s1957_s28 + $0x70] sm:$0xff] %v1779_v16  ;;  %415 = vst [vmem:[%s1957_s28 + $0x78] sm:$0xff] %v1779_v16 }
  0x49 PF: > { %v1555_v17 = vld [vmem:[%s1955_s22 + $0x4] ss:$8 sps:$4 sm:$0xff]   ;;  %v1557_v18 = vld [vmem:[%s1955_s22] ss:$8 sps:$4 sm:$0xff]   ;;  %v1780_v19 = vmov 0   ;;  %v1581_v40 = vld [vmem:[%s1944_s6 + $0x10] sm:$0xff]   ;;  %v450_v58 = vlaneseq }
  0x4a   : > { %620 = vmatprep.mubr.bf16.mxu0 %v1780_v19  ;;  %588 = vmatprep.subr.bf16.mxu0 %v1555_v17  ;;  %v1558_v20 = vld [vmem:[%s1955_s22 + $0x14] ss:$8 sps:$4 sm:$0xff]   ;;  %v1560_v21 = vld [vmem:[%s1955_s22 + $0x10] ss:$8 sps:$4 sm:$0xff]   ;;  %v1561_v22 = vld [vmem:[%s1955_s22 + $0x24] ss:$8 sps:$4 sm:$0xff]  }
  0x4b   : > { %589 = vmatpush1.bf16.msra.mxu0 %v1557_v18  ;;  %v1563_v23 = vld [vmem:[%s1955_s22 + $0x20] ss:$8 sps:$4 sm:$0xff]   ;;  %v1564_v24 = vld [vmem:[%s1955_s22 + $0x34] ss:$8 sps:$4 sm:$0xff]   ;;  %v1566_v25 = vld [vmem:[%s1955_s22 + $0x30] ss:$8 sps:$4 sm:$0xff]  }
  0x4c   : > { %590 = vmatprep.subr.bf16.mxu0 %v1558_v20  ;;  %v1567_v26 = vld [vmem:[%s1955_s22 + $0x44] ss:$8 sps:$4 sm:$0xff]   ;;  %v1569_v27 = vld [vmem:[%s1955_s22 + $0x40] ss:$8 sps:$4 sm:$0xff]   ;;  %v1570_v28 = vld [vmem:[%s1955_s22 + $0x54] ss:$8 sps:$4 sm:$0xff]  }
  0x4d   : > { %v1572_v29 = vld [vmem:[%s1955_s22 + $0x50] ss:$8 sps:$4 sm:$0xff]   ;;  %v1573_v30 = vld [vmem:[%s1955_s22 + $0x64] ss:$8 sps:$4 sm:$0xff]   ;;  %v1575_v33 = vld [vmem:[%s1955_s22 + $0x60] ss:$8 sps:$4 sm:$0xff]  }
  0x4e   : > { %v1587_v31 = vld [vmem:[%s1953_s11 + $0x40] sm:$0xff]   ;;  %v1589_v34 = vld [vmem:[%s1953_s11 + $0x48] sm:$0xff]   ;;  %v1576_v35 = vld [vmem:[%s1955_s22 + $0x74] ss:$8 sps:$4 sm:$0xff]   ;;  %v451_v59 = vshrl.u32 %v450_v58, 7  ;;  %p1391_p7 = scmp.ne.s32.totalorder %s1761_s23, 1 }
  0x4f   : > { %591 = vmatpush1.bf16.msra.mxu0 %v1560_v21  ;;  %v1588_v32 = vld [vmem:[%s1953_s11] sm:$0xff]   ;;  %1400 = vmatprep.subr.bf16.mxu1 %v1587_v31  ;;  %v1590_v36 = vld [vmem:[%s1953_s11 + $0x8] sm:$0xff]   ;;  %v1578_v37 = vld [vmem:[%s1955_s22 + $0x70] ss:$8 sps:$4 sm:$0xff]  }
  0x50   : > { %592 = vmatprep.subr.bf16.mxu0 %v1561_v22  ;;  %1401 = vmatpush3.bf16.msra.mxu1 %v1588_v32  ;;  %v1579_v38 = vld [vmem:[%s1944_s6] sm:$0xff]   ;;  %v1580_v39 = vld [vmem:[%s1944_s6 + $0x8] sm:$0xff]   ;;  %v1582_v41 = vld [vmem:[%s1944_s6 + $0x18] sm:$0xff]   ;;  %v452_v60 = vsub.s32 0, %v451_v59  ;;  %v456_v62 = vsub.s32 1, %v451_v59 }
  0x51   : > { %1402 = vmatprep.subr.bf16.mxu1 %v1589_v34  ;;  %v1583_v42 = vld [vmem:[%s1944_s6 + $0x20] sm:$0xff]   ;;  %v1584_v43 = vld [vmem:[%s1944_s6 + $0x28] sm:$0xff]   ;;  %v1585_v44 = vld [vmem:[%s1944_s6 + $0x30] sm:$0xff]  }
  0x52   : > { %v1586_v45 = vld [vmem:[%s1944_s6 + $0x38] sm:$0xff]   ;;  %v1591_v46 = vld [vmem:[%s1953_s11 + $0x50] sm:$0xff]   ;;  %v1595_v50 = vld [vmem:[%s1953_s11 + $0x60] sm:$0xff]  }
  0x53   : > { %593 = vmatpush1.bf16.msra.mxu0 %v1563_v23  ;;  %v1592_v47 = vld [vmem:[%s1953_s11 + $0x10] sm:$0xff]   ;;  %v1593_v48 = vld [vmem:[%s1953_s11 + $0x58] sm:$0xff]   ;;  %v1596_v51 = vld [vmem:[%s1953_s11 + $0x20] sm:$0xff]  }
  0x54   : > { %594 = vmatprep.subr.bf16.mxu0 %v1564_v24  ;;  %1403 = vmatpush3.bf16.msra.mxu1 %v1590_v36  ;;  %v1594_v49 = vld [vmem:[%s1953_s11 + $0x18] sm:$0xff]   ;;  %v1597_v52 = vld [vmem:[%s1953_s11 + $0x68] sm:$0xff]   ;;  %v1599_v54 = vld [vmem:[%s1953_s11 + $0x70] sm:$0xff]  }
  0x55   : > { %1404 = vmatprep.subr.bf16.mxu1 %v1591_v46  ;;  %v1598_v53 = vld [vmem:[%s1953_s11 + $0x28] sm:$0xff]   ;;  %v1600_v55 = vld [vmem:[%s1953_s11 + $0x30] sm:$0xff]   ;;  %v1601_v56 = vld [vmem:[%s1953_s11 + $0x78] sm:$0xff]  }
  0x56   : > { %v1602_v57 = vld [vmem:[%s1953_s11 + $0x38] sm:$0xff]   ;;  %v448_v61 = vld [vmem:[%s386_s12] sm:$0x3] }
  0x57   : > { %595 = vmatpush1.bf16.msra.mxu0 %v1566_v25  ;;  %v2021_v63 = vrot.slane %v448_v61, %v452_v60  ;;  %v2023_v0 = vrot.slane %v448_v61, %v456_v62 }
  0x58   : > { %596 = vmatprep.subr.bf16.mxu0 %v1567_v26  ;;  %1405 = vmatpush3.bf16.msra.mxu1 %v1592_v47 }
  0x59   : > { %1406 = vmatprep.subr.bf16.mxu1 %v1593_v48 }
  0x5b   : > { %597 = vmatpush1.bf16.msra.mxu0 %v1569_v27 }
  0x5c   : > { %598 = vmatprep.subr.bf16.mxu0 %v1570_v28  ;;  %1407 = vmatpush3.bf16.msra.mxu1 %v1594_v49 }
  0x5d   : > { %1408 = vmatprep.subr.bf16.mxu1 %v1595_v50 }
  0x5f   : > { %599 = vmatpush1.bf16.msra.mxu0 %v1572_v29 }
  0x60   : > { %600 = vmatprep.subr.bf16.mxu0 %v1573_v30  ;;  %1409 = vmatpush3.bf16.msra.mxu1 %v1596_v51 }
  0x61   : > { %1410 = vmatprep.subr.bf16.mxu1 %v1597_v52 }
  0x63   : > { %601 = vmatpush1.bf16.msra.mxu0 %v1575_v33 }
  0x64   : > { %602 = vmatprep.subr.bf16.mxu0 %v1576_v35  ;;  %1411 = vmatpush3.bf16.msra.mxu1 %v1598_v53 }
  0x65   : > { %1412 = vmatprep.subr.bf16.mxu1 %v1599_v54 }
  0x67   : > { %603 = vmatpush1.bf16.msra.mxu0 %v1578_v37 }
  0x68   : > { %1413 = vmatpush3.bf16.msra.mxu1 %v1600_v55 }
  0x69   : > { %1414 = vmatprep.subr.bf16.mxu1 %v1601_v56 }
  0x6a   : > { %621 = vmatmul.mubr.bf16.vlgmr.msra.gmra.mrb[0].mxu0 %v1579_v38 }
  0x6b   : > { %630 = vmatprep.mubr.bf16.mxu0 %v1780_v19 }
  0x6c   : > { %1415 = vmatpush3.bf16.msra.mxu1 %v1602_v57 }
  0x72   : > { %631 = vmatmul.mubr.bf16.gmra.mrb[4].mxu0 %v1580_v39 }
  0x73   : > { %640 = vmatprep.mubr.bf16.mxu0 %v1780_v19 }
  0x7a   : > { %641 = vmatmul.mubr.bf16.gmra.mrb[8].mxu0 %v1581_v40 }
  0x7b   : > { %650 = vmatprep.mubr.bf16.mxu0 %v1780_v19 }
  0x82   : > { %651 = vmatmul.mubr.bf16.gmra.mrb[12].mxu0 %v1582_v41 }
  0x83   : > { %660 = vmatprep.mubr.bf16.mxu0 %v1780_v19 }
  0x8a   : > { %661 = vmatmul.mubr.bf16.gmra.mrb[16].mxu0 %v1583_v42 }
  0x8b   : > { %670 = vmatprep.mubr.bf16.mxu0 %v1780_v19 }
  0x92   : > { %671 = vmatmul.mubr.bf16.gmra.mrb[20].mxu0 %v1584_v43 }
  0x93   : > { %680 = vmatprep.mubr.bf16.mxu0 %v1780_v19 }
  0x9a   : > { %681 = vmatmul.mubr.bf16.gmra.mrb[24].mxu0 %v1585_v44 }
  0x9b   : > { %690 = vmatprep.mubr.bf16.mxu0 %v1780_v19 }
  0xa2   : > { %691 = vmatmul.mubr.bf16.gmra.mrb[28].mxu0 %v1586_v45 }
 0x13d   : > { %v622_v1 = vpop.f32.mrb[0].mxu0 }
 0x13e   : > { %v623_v2 = vadd.f32 %v622_v1, %v2021_v63  ;;  %v624_v3 = vpop.f32.mrb[1].mxu0 }
 0x13f   : > { %v625_v4 = vadd.f32 %v624_v3, %v2023_v0  ;;  %v626_v5 = vpop.f32.mrb[2].mxu0 }
 0x140   : > { %v733_v6 = vmul.f32 0.70710677, %v623_v2  ;;  %v627_v7 = vadd.f32 %v626_v5, %v2021_v63  ;;  %v628_v8 = vpop.f32.mrb[3].mxu0  ;;  %v701_v29 = vmul.f32 0.5, %v623_v2 }
 0x141   : > { %v734_v9 = vmul.f32 0.70710677, %v625_v4  ;;  %v629_v10 = vadd.f32 %v628_v8, %v2023_v0  ;;  %v702_v39 = vmul.f32 0.5, %v625_v4 }
 0x142   : > { %1603 = verf.f32 %v733_v6  ;;  %v735_v11 = vmul.f32 0.70710677, %v627_v7  ;;  %v703_v34 = vmul.f32 0.5, %v627_v7 }
 0x143   : > { %1605 = verf.f32 %v734_v9  ;;  %v736_v12 = vmul.f32 0.70710677, %v629_v10  ;;  %v704_v45 = vmul.f32 0.5, %v629_v10 }
 0x144   : > { %1607 = verf.f32 %v735_v11 }
 0x145   : > { %1609 = verf.f32 %v736_v12  ;;  %v632_v13 = vpop.f32.mrb[4].mxu0 }
 0x146   : > { %v633_v14 = vadd.f32 %v632_v13, %v2021_v63  ;;  %v634_v15 = vpop.f32.mrb[5].mxu0 }
 0x147   : > { %v635_v16 = vadd.f32 %v634_v15, %v2023_v0  ;;  %v636_v17 = vpop.f32.mrb[6].mxu0 }
 0x148   : > { %v737_v18 = vmul.f32 0.70710677, %v633_v14  ;;  %v637_v19 = vadd.f32 %v636_v17, %v2021_v63  ;;  %v638_v20 = vpop.f32.mrb[7].mxu0  ;;  %v705_v2 = vmul.f32 0.5, %v633_v14 }
 0x149   : > { %v738_v21 = vmul.f32 0.70710677, %v635_v16  ;;  %v639_v22 = vadd.f32 %v638_v20, %v2023_v0  ;;  %v706_v7 = vmul.f32 0.5, %v635_v16 }
 0x14a   : > { %1611 = verf.f32 %v737_v18  ;;  %v739_v23 = vmul.f32 0.70710677, %v637_v19  ;;  %v707_v3 = vmul.f32 0.5, %v637_v19 }
 0x14b   : > { %1613 = verf.f32 %v738_v21  ;;  %v740_v24 = vmul.f32 0.70710677, %v639_v22  ;;  %v708_v8 = vmul.f32 0.5, %v639_v22 }
 0x14c   : > { %v1604_v25 = vpop.eup %1603  ;;  %1615 = verf.f32 %v739_v23 }
 0x14d   : > { %v1606_v26 = vpop.eup %1605  ;;  %1617 = verf.f32 %v740_v24  ;;  %v642_v27 = vpop.f32.mrb[8].mxu0  ;;  %v797_v30 = vadd.f32 1.0, %v1604_v25 }
 0x14e   : > { %v1608_v28 = vpop.eup %1607  ;;  %v2034_v31 = vadd.f32 %v642_v27, %v2021_v63  ;;  %v644_v32 = vpop.f32.mrb[9].mxu0  ;;  %v798_v38 = vadd.f32 1.0, %v1606_v26 }
 0x14f   : > { %v1610_v33 = vpop.eup %1609  ;;  %v799_v35 = vadd.f32 1.0, %v1608_v28  ;;  %v2037_v36 = vadd.f32 %v644_v32, %v2023_v0  ;;  %v646_v37 = vpop.f32.mrb[10].mxu0  ;;  %v829_v48 = vmul.f32 %v797_v30, %v701_v29 }
 0x150   : > { %v741_v40 = vmul.f32 0.70710677, %v2034_v31  ;;  %v2041_v41 = vadd.f32 %v646_v37, %v2021_v63  ;;  %v648_v42 = vpop.f32.mrb[11].mxu0  ;;  %v800_v43 = vadd.f32 1.0, %v1610_v33  ;;  %v830_v51 = vmul.f32 %v798_v38, %v702_v39 }
 0x151   : > { %v831_v44 = vmul.f32 %v799_v35, %v703_v34  ;;  %v742_v46 = vmul.f32 0.70710677, %v2037_v36  ;;  %v2045_v47 = vadd.f32 %v648_v42, %v2023_v0  ;;  %v709_v33 = vmul.f32 0.5, %v2034_v31 }
 0x152   : > { %1619 = verf.f32 %v741_v40  ;;  %v743_v49 = vmul.f32 0.70710677, %v2041_v41  ;;  %v832_v52 = vmul.f32 %v800_v43, %v704_v45  ;;  %v711_v34 = vmul.f32 0.5, %v2041_v41 }
 0x153   : > { %1621 = verf.f32 %v742_v46  ;;  %v744_v50 = vmul.f32 0.70710677, %v2045_v47  ;;  %v877_v54 = vpack.c.bf16 %v831_v44, %v829_v48  ;;  %v710_v39 = vmul.f32 0.5, %v2037_v36 }
 0x154   : > { %v1612_v53 = vpop.eup %1611  ;;  %1623 = verf.f32 %v743_v49  ;;  %v878_v58 = vpack.c.bf16 %v832_v52, %v830_v51  ;;  %v712_v40 = vmul.f32 0.5, %v2045_v47 }
 0x155   : > { %v1614_v55 = vpop.eup %1613  ;;  %v801_v56 = vadd.f32 1.0, %v1612_v53  ;;  %1625 = verf.f32 %v744_v50  ;;  %v652_v57 = vpop.f32.mrb[12].mxu0 }
 0x156   : > { %v1616_v59 = vpop.eup %1615  ;;  %v802_v60 = vadd.f32 1.0, %v1614_v55  ;;  %v2050_v61 = vadd.f32 %v652_v57, %v2021_v63  ;;  %v654_v62 = vpop.f32.mrb[13].mxu0  ;;  %1053 = vmatprep.mubr.bf16.mxu1 %v878_v58 }
 0x157   : > { %v1618_v1 = vpop.eup %1617  ;;  %v803_v4 = vadd.f32 1.0, %v1616_v59  ;;  %v2053_v5 = vadd.f32 %v654_v62, %v2023_v0  ;;  %v656_v6 = vpop.f32.mrb[14].mxu0  ;;  %1054 = vmatmul.mubr.bf16.vlgmr.msra.gmra.mrb[0].mxu1 %v877_v54  ;;  %v833_v12 = vmul.f32 %v801_v56, %v705_v2 }
 0x158   : > { %v804_v9 = vadd.f32 1.0, %v1618_v1  ;;  %v745_v10 = vmul.f32 0.70710677, %v2050_v61  ;;  %v658_v11 = vpop.f32.mrb[15].mxu0  ;;  %v657_v14 = vadd.f32 %v656_v6, %v2021_v63  ;;  %v834_v17 = vmul.f32 %v802_v60, %v706_v7 }
 0x159   : > { %v835_v13 = vmul.f32 %v803_v4, %v707_v3  ;;  %v746_v15 = vmul.f32 0.70710677, %v2053_v5  ;;  %v659_v19 = vadd.f32 %v658_v11, %v2023_v0  ;;  %v713_v60 = vmul.f32 0.5, %v2050_v61 }
 0x15a   : > { %v836_v18 = vmul.f32 %v804_v9, %v708_v8  ;;  %1627 = verf.f32 %v745_v10  ;;  %v747_v20 = vmul.f32 0.70710677, %v657_v14  ;;  %v714_v4 = vmul.f32 0.5, %v2053_v5 }
 0x15b   : > { %1629 = verf.f32 %v746_v15  ;;  %v879_v16 = vpack.c.bf16 %v835_v13, %v833_v12  ;;  %v748_v22 = vmul.f32 0.70710677, %v659_v19  ;;  %v715_v6 = vmul.f32 0.5, %v657_v14 }
 0x15c   : > { %v1620_v21 = vpop.eup %1619  ;;  %v880_v23 = vpack.c.bf16 %v836_v18, %v834_v17  ;;  %1631 = verf.f32 %v747_v20  ;;  %v716_v10 = vmul.f32 0.5, %v659_v19 }
 0x15d   : > { %v1622_v24 = vpop.eup %1621  ;;  %v805_v25 = vadd.f32 1.0, %v1620_v21  ;;  %v662_v26 = vpop.f32.mrb[16].mxu0  ;;  %1633 = verf.f32 %v748_v22 }
 0x15e   : > { %v1624_v27 = vpop.eup %1623  ;;  %v806_v28 = vadd.f32 1.0, %v1622_v24  ;;  %v2060_v29 = vadd.f32 %v662_v26, %v2021_v63  ;;  %v664_v30 = vpop.f32.mrb[17].mxu0  ;;  %1061 = vmatprep.mubr.bf16.mxu1 %v880_v23 }
 0x15f   : > { %v1626_v32 = vpop.eup %1625  ;;  %v807_v35 = vadd.f32 1.0, %v1624_v27  ;;  %v2065_v37 = vadd.f32 %v664_v30, %v2023_v0  ;;  %v666_v38 = vpop.f32.mrb[18].mxu0  ;;  %1062 = vmatmul.mubr.bf16.gmra.mrb[4].mxu1 %v879_v16  ;;  %v837_v45 = vmul.f32 %v805_v25, %v709_v33 }
 0x160   : > { %v808_v42 = vadd.f32 1.0, %v1626_v32  ;;  %v749_v43 = vmul.f32 0.70710677, %v2060_v29  ;;  %v668_v44 = vpop.f32.mrb[19].mxu0  ;;  %v667_v41 = vadd.f32 %v666_v38, %v2021_v63  ;;  %v838_v48 = vmul.f32 %v806_v28, %v710_v39 }
 0x161   : > { %v839_v46 = vmul.f32 %v807_v35, %v711_v34  ;;  %v750_v31 = vmul.f32 0.70710677, %v2065_v37  ;;  %v669_v50 = vadd.f32 %v668_v44, %v2023_v0  ;;  %v717_v28 = vmul.f32 0.5, %v2060_v29 }
 0x162   : > { %v840_v49 = vmul.f32 %v808_v42, %v712_v40  ;;  %1635 = verf.f32 %v749_v43  ;;  %v751_v36 = vmul.f32 0.70710677, %v667_v41  ;;  %v718_v35 = vmul.f32 0.5, %v2065_v37 }
 0x163   : > { %1637 = verf.f32 %v750_v31  ;;  %v881_v51 = vpack.c.bf16 %v839_v46, %v837_v45  ;;  %v752_v52 = vmul.f32 0.70710677, %v669_v50  ;;  %v719_v38 = vmul.f32 0.5, %v667_v41 }
 0x164   : > { %v1628_v47 = vpop.eup %1627  ;;  %v882_v53 = vpack.c.bf16 %v840_v49, %v838_v48  ;;  %1639 = verf.f32 %v751_v36  ;;  %v720_v43 = vmul.f32 0.5, %v669_v50 }
 0x165   : > { %v1630_v54 = vpop.eup %1629  ;;  %v672_v55 = vpop.f32.mrb[20].mxu0  ;;  %v809_v56 = vadd.f32 1.0, %v1628_v47  ;;  %1641 = verf.f32 %v752_v52 }
 0x166   : > { %v2074_v57 = vadd.f32 %v672_v55, %v2021_v63  ;;  %v674_v58 = vpop.f32.mrb[21].mxu0  ;;  %1069 = vmatprep.mubr.bf16.mxu1 %v882_v53  ;;  %v1632_v59 = vpop.eup %1631  ;;  %v810_v62 = vadd.f32 1.0, %v1630_v54 }
 0x167   : > { %v2078_v1 = vadd.f32 %v674_v58, %v2023_v0  ;;  %v676_v2 = vpop.f32.mrb[22].mxu0  ;;  %v1634_v3 = vpop.eup %1633  ;;  %v811_v7 = vadd.f32 1.0, %v1632_v59  ;;  %1070 = vmatmul.mubr.bf16.gmra.mrb[8].mxu1 %v881_v51  ;;  %v841_v13 = vmul.f32 %v809_v56, %v713_v60 }
 0x168   : > { %v753_v8 = vmul.f32 0.70710677, %v2074_v57  ;;  %v678_v9 = vpop.f32.mrb[23].mxu0  ;;  %v812_v11 = vadd.f32 1.0, %v1634_v3  ;;  %v2084_v61 = vadd.f32 %v676_v2, %v2021_v63  ;;  %v842_v5 = vmul.f32 %v810_v62, %v714_v4 }
 0x169   : > { %v754_v12 = vmul.f32 0.70710677, %v2078_v1  ;;  %v843_v15 = vmul.f32 %v811_v7, %v715_v6  ;;  %v2087_v17 = vadd.f32 %v678_v9, %v2023_v0  ;;  %v721_v59 = vmul.f32 0.5, %v2074_v57 }
 0x16a   : > { %1643 = verf.f32 %v753_v8  ;;  %v844_v14 = vmul.f32 %v812_v11, %v716_v10  ;;  %v755_v18 = vmul.f32 0.70710677, %v2084_v61  ;;  %v722_v4 = vmul.f32 0.5, %v2078_v1 }
 0x16b   : > { %1645 = verf.f32 %v754_v12  ;;  %v756_v19 = vmul.f32 0.70710677, %v2087_v17  ;;  %v883_v16 = vpack.c.bf16 %v843_v15, %v841_v13  ;;  %v723_v6 = vmul.f32 0.5, %v2084_v61 }
 0x16c   : > { %v1636_v20 = vpop.eup %1635  ;;  %1647 = verf.f32 %v755_v18  ;;  %v884_v23 = vpack.c.bf16 %v844_v14, %v842_v5  ;;  %v724_v10 = vmul.f32 0.5, %v2087_v17 }
 0x16d   : > { %v1638_v21 = vpop.eup %1637  ;;  %v682_v22 = vpop.f32.mrb[24].mxu0  ;;  %v813_v24 = vadd.f32 1.0, %v1636_v20  ;;  %1649 = verf.f32 %v756_v19 }
 0x16e   : > { %v2092_v25 = vadd.f32 %v682_v22, %v2021_v63  ;;  %v684_v26 = vpop.f32.mrb[25].mxu0  ;;  %v1640_v27 = vpop.eup %1639  ;;  %v814_v30 = vadd.f32 1.0, %v1638_v21  ;;  %1077 = vmatprep.mubr.bf16.mxu1 %v884_v23 }
 0x16f   : > { %v2096_v32 = vadd.f32 %v684_v26, %v2023_v0  ;;  %v686_v33 = vpop.f32.mrb[26].mxu0  ;;  %v1642_v34 = vpop.eup %1641  ;;  %v815_v39 = vadd.f32 1.0, %v1640_v27  ;;  %1078 = vmatmul.mubr.bf16.gmra.mrb[12].mxu1 %v883_v16  ;;  %v845_v46 = vmul.f32 %v813_v24, %v717_v28 }
 0x170   : > { %v757_v40 = vmul.f32 0.70710677, %v2092_v25  ;;  %v688_v42 = vpop.f32.mrb[27].mxu0  ;;  %v816_v44 = vadd.f32 1.0, %v1642_v34  ;;  %v687_v29 = vadd.f32 %v686_v33, %v2021_v63  ;;  %v846_v49 = vmul.f32 %v814_v30, %v718_v35 }
 0x171   : > { %v758_v45 = vmul.f32 0.70710677, %v2096_v32  ;;  %v847_v31 = vmul.f32 %v815_v39, %v719_v38  ;;  %v689_v48 = vadd.f32 %v688_v42, %v2023_v0  ;;  %v725_v24 = vmul.f32 0.5, %v2092_v25 }
 0x172   : > { %1651 = verf.f32 %v757_v40  ;;  %v848_v36 = vmul.f32 %v816_v44, %v720_v43  ;;  %v759_v37 = vmul.f32 0.70710677, %v687_v29  ;;  %v727_v26 = vmul.f32 0.5, %v687_v29 }
 0x173   : > { %1653 = verf.f32 %v758_v45  ;;  %v760_v51 = vmul.f32 0.70710677, %v689_v48  ;;  %v885_v47 = vpack.c.bf16 %v847_v31, %v845_v46  ;;  %v726_v27 = vmul.f32 0.5, %v2096_v32 }
 0x174   : > { %v1644_v41 = vpop.eup %1643  ;;  %1655 = verf.f32 %v759_v37  ;;  %v886_v53 = vpack.c.bf16 %v848_v36, %v846_v49  ;;  %v728_v28 = vmul.f32 0.5, %v689_v48 }
 0x175   : > { %v1646_v52 = vpop.eup %1645  ;;  %v692_v50 = vpop.f32.mrb[28].mxu0  ;;  %v817_v54 = vadd.f32 1.0, %v1644_v41  ;;  %1657 = verf.f32 %v760_v51 }
 0x176   : > { %v693_v55 = vadd.f32 %v692_v50, %v2021_v63  ;;  %v694_v56 = vpop.f32.mrb[29].mxu0  ;;  %v1648_v58 = vpop.eup %1647  ;;  %v818_v60 = vadd.f32 1.0, %v1646_v52  ;;  %1085 = vmatprep.mubr.bf16.mxu1 %v886_v53 }
 0x177   : > { %v695_v62 = vadd.f32 %v694_v56, %v2023_v0  ;;  %v696_v2 = vpop.f32.mrb[30].mxu0  ;;  %v1650_v3 = vpop.eup %1649  ;;  %v819_v7 = vadd.f32 1.0, %v1648_v58  ;;  %1086 = vmatmul.mubr.bf16.gmra.mrb[16].mxu1 %v885_v47  ;;  %v849_v13 = vmul.f32 %v817_v54, %v721_v59  ;;  %v861_v54 = vld [vmem:[%s1957_s28] sm:$0xff]  ;;  %v862_v59 = vld [vmem:[%s1957_s28 + $0x8] sm:$0xff] }
 0x178   : > { %v761_v8 = vmul.f32 0.70710677, %v693_v55  ;;  %v698_v9 = vpop.f32.mrb[31].mxu0  ;;  %v820_v11 = vadd.f32 1.0, %v1650_v3  ;;  %v697_v57 = vadd.f32 %v696_v2, %v2021_v63  ;;  %v850_v14 = vmul.f32 %v818_v60, %v722_v4 }
 0x179   : > { %v762_v12 = vmul.f32 0.70710677, %v695_v62  ;;  %v851_v15 = vmul.f32 %v819_v7, %v723_v6  ;;  %v699_v5 = vadd.f32 %v698_v9, %v2023_v0  ;;  %v729_v29 = vmul.f32 0.5, %v693_v55  ;;  %v863_v6 = vld [vmem:[%s1957_s28 + $0x10] sm:$0xff] }
 0x17a   : > { %1659 = verf.f32 %v761_v8  ;;  %v852_v18 = vmul.f32 %v820_v11, %v724_v10  ;;  %v763_v1 = vmul.f32 0.70710677, %v697_v57  ;;  %v731_v31 = vmul.f32 0.5, %v697_v57  ;;  %v864_v10 = vld [vmem:[%s1957_s28 + $0x18] sm:$0xff] }
 0x17b   : > { %1661 = verf.f32 %v762_v12  ;;  %v764_v20 = vmul.f32 0.70710677, %v699_v5  ;;  %v887_v19 = vpack.c.bf16 %v851_v15, %v849_v13  ;;  %v730_v32 = vmul.f32 0.5, %v695_v62 }
 0x17c   : > { %v1652_v61 = vpop.eup %1651  ;;  %1663 = verf.f32 %v763_v1  ;;  %v888_v21 = vpack.c.bf16 %v852_v18, %v850_v14  ;;  %v732_v48 = vmul.f32 0.5, %v699_v5  ;;  %v865_v5 = vld [vmem:[%s1957_s28 + $0x20] sm:$0xff] }
 0x17d   : > { %v1654_v16 = vpop.eup %1653  ;;  %v821_v17 = vadd.f32 1.0, %v1652_v61  ;;  %1665 = verf.f32 %v764_v20  ;;  %v866_v61 = vld [vmem:[%s1957_s28 + $0x28] sm:$0xff] }
 0x17e   : > { %v1656_v22 = vpop.eup %1655  ;;  %v822_v23 = vadd.f32 1.0, %v1654_v16  ;;  %1093 = vmatprep.mubr.bf16.mxu1 %v888_v21 }
 0x17f   : > { %v1658_v63 = vpop.eup %1657  ;;  %v823_v0 = vadd.f32 1.0, %v1656_v22  ;;  %1094 = vmatmul.mubr.bf16.gmra.mrb[20].mxu1 %v887_v19  ;;  %v853_v33 = vmul.f32 %v821_v17, %v725_v24  ;;  %v867_v22 = vld [vmem:[%s1957_s28 + $0x30] sm:$0xff] }
 0x180   : > { %v824_v30 = vadd.f32 1.0, %v1658_v63  ;;  %v854_v35 = vmul.f32 %v822_v23, %v726_v27 }
 0x181   : > { %v855_v34 = vmul.f32 %v823_v0, %v727_v26  ;;  %v868_v26 = vld [vmem:[%s1957_s28 + $0x38] sm:$0xff] }
 0x182   : > { %v856_v38 = vmul.f32 %v824_v30, %v728_v28 }
 0x183   : > { %v889_v40 = vpack.c.bf16 %v855_v34, %v853_v33  ;;  %v869_v34 = vld [vmem:[%s1957_s28 + $0x40] sm:$0xff] }
 0x184   : > { %v1660_v39 = vpop.eup %1659  ;;  %v890_v43 = vpack.c.bf16 %v856_v38, %v854_v35 }
 0x185   : > { %v1662_v42 = vpop.eup %1661  ;;  %v825_v44 = vadd.f32 1.0, %v1660_v39 }
 0x186   : > { %v1664_v45 = vpop.eup %1663  ;;  %v826_v46 = vadd.f32 1.0, %v1662_v42  ;;  %1101 = vmatprep.mubr.bf16.mxu1 %v890_v43 }
 0x187   : > { %v1666_v25 = vpop.eup %1665  ;;  %v827_v49 = vadd.f32 1.0, %v1664_v45  ;;  %1102 = vmatmul.mubr.bf16.gmra.mrb[24].mxu1 %v889_v40  ;;  %v857_v37 = vmul.f32 %v825_v44, %v729_v29  ;;  %v870_v40 = vld [vmem:[%s1957_s28 + $0x48] sm:$0xff] }
 0x188   : > { %v828_v36 = vadd.f32 1.0, %v1666_v25  ;;  %v858_v51 = vmul.f32 %v826_v46, %v730_v32  ;;  %v871_v25 = vld [vmem:[%s1957_s28 + $0x50] sm:$0xff]  ;;  %v872_v32 = vld [vmem:[%s1957_s28 + $0x58] sm:$0xff] }
 0x189   : > { %v859_v41 = vmul.f32 %v827_v49, %v731_v31 }
 0x18a   : > { %v860_v47 = vmul.f32 %v828_v36, %v732_v48 }
 0x18b   : > { %v891_v52 = vpack.c.bf16 %v859_v41, %v857_v37 }
 0x18c   : > { %v892_v50 = vpack.c.bf16 %v860_v47, %v858_v51  ;;  %v873_v47 = vld [vmem:[%s1957_s28 + $0x60] sm:$0xff] }
 0x18e   : > { %1109 = vmatprep.mubr.bf16.mxu1 %v892_v50 }
 0x18f   : > { %1110 = vmatmul.mubr.bf16.gmra.mrb[28].mxu1 %v891_v52 }
 0x22a   : > { %v1416_v53 = vpop.f32.mrb[0].mxu1 }
 0x22b   : > { %v1417_v55 = vpop.f32.mrb[1].mxu1 }
 0x22c   : > { %v1418_v56 = vadd.f32 %v1417_v55, %v1416_v53  ;;  %v1419_v58 = vpop.f32.mrb[2].mxu1 }
 0x22d   : > { %v1420_v60 = vpop.f32.mrb[3].mxu1 }
 0x22e   : > { %v1118_v62 = vadd.f32 %v1418_v56, %v861_v54  ;;  %v1421_v2 = vadd.f32 %v1420_v60, %v1419_v58  ;;  %v874_v54 = vld [vmem:[%s1957_s28 + $0x68] sm:$0xff] }
 0x230   : > { %1134 = vst [vmem:[%s1957_s28] sm:$0xff] %v1118_v62  ;;  %v1119_v3 = vadd.f32 %v1421_v2, %v862_v59  ;;  %v875_v62 = vld [vmem:[%s1957_s28 + $0x70] sm:$0xff] }
 0x232   : > { %1135 = vst [vmem:[%s1957_s28 + $0x8] sm:$0xff] %v1119_v3  ;;  %v1422_v4 = vpop.f32.mrb[4].mxu1 }
 0x233   : > { %v1423_v7 = vpop.f32.mrb[5].mxu1 }
 0x234   : > { %v1424_v8 = vadd.f32 %v1423_v7, %v1422_v4  ;;  %v1425_v9 = vpop.f32.mrb[6].mxu1 }
 0x235   : > { %v1426_v11 = vpop.f32.mrb[7].mxu1 }
 0x236   : > { %v1120_v12 = vadd.f32 %v1424_v8, %v863_v6  ;;  %v1427_v57 = vadd.f32 %v1426_v11, %v1425_v9  ;;  %v876_v6 = vld [vmem:[%s1957_s28 + $0x78] sm:$0xff] }
 0x237   : > { %v1154_v11 = vld [vmem:[%s1957_s28] sm:$0xff] (!%p1391_p7) }
 0x238   : > { %1136 = vst [vmem:[%s1957_s28 + $0x10] sm:$0xff] %v1120_v12  ;;  %v1121_v13 = vadd.f32 %v1427_v57, %v864_v10  ;;  %v1392_v12 = vld [vmem:[%s2254_s4] ss:$0 sm:$0xff] (!%p1391_p7) }
 0x239   : > { %v1155_v57 = vld [vmem:[%s1957_s28 + $0x8] sm:$0xff] (!%p1391_p7) }
 0x23a   : > { %1137 = vst [vmem:[%s1957_s28 + $0x18] sm:$0xff] %v1121_v13  ;;  %v1428_v15 = vpop.f32.mrb[8].mxu1  ;;  %v1177_v13 = vadd.f32 (!%p1391_p7), %v1392_v12, %v1154_v11 }
 0x23b   : > { %v1429_v14 = vpop.f32.mrb[9].mxu1 }
 0x23c   : > { %v1430_v18 = vadd.f32 %v1429_v14, %v1428_v15  ;;  %v1431_v1 = vpop.f32.mrb[10].mxu1  ;;  %v1178_v15 = vadd.f32 (!%p1391_p7), %v1392_v12, %v1155_v57  ;;  %1193 = vst [vmem:[%s1957_s28] sm:$0xff] (!%p1391_p7), %v1177_v13 }
 0x23d   : > { %v1432_v20 = vpop.f32.mrb[11].mxu1 }
 0x23e   : > { %v1122_v19 = vadd.f32 %v1430_v18, %v865_v5  ;;  %v1433_v16 = vadd.f32 %v1432_v20, %v1431_v1  ;;  %1194 = vst [vmem:[%s1957_s28 + $0x8] sm:$0xff] (!%p1391_p7), %v1178_v15 }
 0x23f   : > { %v1156_v5 = vld [vmem:[%s1957_s28 + $0x10] sm:$0xff] (!%p1391_p7) }
 0x240   : > { %1138 = vst [vmem:[%s1957_s28 + $0x20] sm:$0xff] %v1122_v19  ;;  %v1123_v21 = vadd.f32 %v1433_v16, %v866_v61  ;;  %v1179_v1 = vadd.f32 (!%p1391_p7), %v1392_v12, %v1156_v5 }
 0x241   : > { %v1157_v14 = vld [vmem:[%s1957_s28 + $0x18] sm:$0xff] (!%p1391_p7) }
 0x242   : > { %1139 = vst [vmem:[%s1957_s28 + $0x28] sm:$0xff] %v1123_v21  ;;  %v1434_v17 = vpop.f32.mrb[12].mxu1  ;;  %v1180_v61 = vadd.f32 (!%p1391_p7), %v1392_v12, %v1157_v14  ;;  %1195 = vst [vmem:[%s1957_s28 + $0x10] sm:$0xff] (!%p1391_p7), %v1179_v1 }
 0x243   : > { %v1435_v23 = vpop.f32.mrb[13].mxu1 }
 0x244   : > { %v1436_v63 = vadd.f32 %v1435_v23, %v1434_v17  ;;  %v1437_v24 = vpop.f32.mrb[14].mxu1  ;;  %1196 = vst [vmem:[%s1957_s28 + $0x18] sm:$0xff] (!%p1391_p7), %v1180_v61 }
 0x245   : > { %v1438_v0 = vpop.f32.mrb[15].mxu1 }
 0x246   : > { %v1124_v27 = vadd.f32 %v1436_v63, %v867_v22  ;;  %v1439_v28 = vadd.f32 %v1438_v0, %v1437_v24 }
 0x247   : > { %v1158_v18 = vld [vmem:[%s1957_s28 + $0x20] sm:$0xff] (!%p1391_p7) }
 0x248   : > { %1140 = vst [vmem:[%s1957_s28 + $0x30] sm:$0xff] %v1124_v27  ;;  %v1125_v30 = vadd.f32 %v1439_v28, %v868_v26  ;;  %v1181_v20 = vadd.f32 (!%p1391_p7), %v1392_v12, %v1158_v18 }
 0x249   : > { %v1159_v19 = vld [vmem:[%s1957_s28 + $0x28] sm:$0xff] (!%p1391_p7) }
 0x24a   : > { %1141 = vst [vmem:[%s1957_s28 + $0x38] sm:$0xff] %v1125_v30  ;;  %v1440_v33 = vpop.f32.mrb[16].mxu1  ;;  %v1182_v17 = vadd.f32 (!%p1391_p7), %v1392_v12, %v1159_v19  ;;  %1197 = vst [vmem:[%s1957_s28 + $0x20] sm:$0xff] (!%p1391_p7), %v1181_v20 }
 0x24b   : > { %v1441_v35 = vpop.f32.mrb[17].mxu1 }
 0x24c   : > { %v1442_v38 = vadd.f32 %v1441_v35, %v1440_v33  ;;  %v1443_v39 = vpop.f32.mrb[18].mxu1  ;;  %1198 = vst [vmem:[%s1957_s28 + $0x28] sm:$0xff] (!%p1391_p7), %v1182_v17 }
 0x24d   : > { %v1444_v42 = vpop.f32.mrb[19].mxu1 }
 0x24e   : > { %v1126_v43 = vadd.f32 %v1442_v38, %v869_v34  ;;  %v1445_v44 = vadd.f32 %v1444_v42, %v1443_v39 }
 0x24f   : > { %v1160_v16 = vld [vmem:[%s1957_s28 + $0x30] sm:$0xff] (!%p1391_p7) }
 0x250   : > { %1142 = vst [vmem:[%s1957_s28 + $0x40] sm:$0xff] %v1126_v43  ;;  %v1127_v45 = vadd.f32 %v1445_v44, %v870_v40  ;;  %v1183_v22 = vadd.f32 (!%p1391_p7), %v1392_v12, %v1160_v16 }
 0x251   : > { %v1161_v21 = vld [vmem:[%s1957_s28 + $0x38] sm:$0xff] (!%p1391_p7) }
 0x252   : > { %1143 = vst [vmem:[%s1957_s28 + $0x48] sm:$0xff] %v1127_v45  ;;  %v1446_v46 = vpop.f32.mrb[20].mxu1  ;;  %v1184_v23 = vadd.f32 (!%p1391_p7), %v1392_v12, %v1161_v21  ;;  %1199 = vst [vmem:[%s1957_s28 + $0x30] sm:$0xff] (!%p1391_p7), %v1183_v22 }
 0x253   : > { %v1447_v29 = vpop.f32.mrb[21].mxu1 }
 0x254   : > { %v1448_v31 = vadd.f32 %v1447_v29, %v1446_v46  ;;  %v1449_v49 = vpop.f32.mrb[22].mxu1  ;;  %1200 = vst [vmem:[%s1957_s28 + $0x38] sm:$0xff] (!%p1391_p7), %v1184_v23 }
 0x255   : > { %v1450_v48 = vpop.f32.mrb[23].mxu1 }
 0x256   : > { %v1128_v36 = vadd.f32 %v1448_v31, %v871_v25  ;;  %v1451_v37 = vadd.f32 %v1450_v48, %v1449_v49 }
 0x257   : > { %v1162_v63 = vld [vmem:[%s1957_s28 + $0x40] sm:$0xff] (!%p1391_p7) }
 0x258   : > { %1144 = vst [vmem:[%s1957_s28 + $0x50] sm:$0xff] %v1128_v36  ;;  %v1129_v41 = vadd.f32 %v1451_v37, %v872_v32  ;;  %v1185_v0 = vadd.f32 (!%p1391_p7), %v1392_v12, %v1162_v63 }
 0x259   : > { %v1163_v24 = vld [vmem:[%s1957_s28 + $0x48] sm:$0xff] (!%p1391_p7) }
 0x25a   : > { %1145 = vst [vmem:[%s1957_s28 + $0x58] sm:$0xff] %v1129_v41  ;;  %v1452_v51 = vpop.f32.mrb[24].mxu1  ;;  %v1186_v27 = vadd.f32 (!%p1391_p7), %v1392_v12, %v1163_v24  ;;  %1201 = vst [vmem:[%s1957_s28 + $0x40] sm:$0xff] (!%p1391_p7), %v1185_v0 }
 0x25b   : > { %v1453_v52 = vpop.f32.mrb[25].mxu1 }
 0x25c   : > { %v1454_v50 = vadd.f32 %v1453_v52, %v1452_v51  ;;  %v1455_v53 = vpop.f32.mrb[26].mxu1  ;;  %1202 = vst [vmem:[%s1957_s28 + $0x48] sm:$0xff] (!%p1391_p7), %v1186_v27 }
 0x25d   : > { %v1456_v55 = vpop.f32.mrb[27].mxu1 }
 0x25e   : > { %v1130_v56 = vadd.f32 %v1454_v50, %v873_v47  ;;  %v1457_v58 = vadd.f32 %v1456_v55, %v1455_v53 }
 0x25f   : > { %v1164_v26 = vld [vmem:[%s1957_s28 + $0x50] sm:$0xff] (!%p1391_p7) }
 0x260   : > { %1146 = vst [vmem:[%s1957_s28 + $0x60] sm:$0xff] %v1130_v56  ;;  %v1131_v59 = vadd.f32 %v1457_v58, %v874_v54  ;;  %v1187_v28 = vadd.f32 (!%p1391_p7), %v1392_v12, %v1164_v26 }
 0x261   : > { %v1165_v30 = vld [vmem:[%s1957_s28 + $0x58] sm:$0xff] (!%p1391_p7) }
 0x262   : > { %1147 = vst [vmem:[%s1957_s28 + $0x68] sm:$0xff] %v1131_v59  ;;  %v1458_v60 = vpop.f32.mrb[28].mxu1  ;;  %v1188_v35 = vadd.f32 (!%p1391_p7), %v1392_v12, %v1165_v30  ;;  %1203 = vst [vmem:[%s1957_s28 + $0x50] sm:$0xff] (!%p1391_p7), %v1187_v28 }
 0x263   : > { %v1459_v2 = vpop.f32.mrb[29].mxu1 }
 0x264   : > { %v1460_v3 = vadd.f32 %v1459_v2, %v1458_v60  ;;  %v1461_v4 = vpop.f32.mrb[30].mxu1  ;;  %1153 = sbr.rel (%p1391_p7) target bundleno = 629 (0x275), region = 86  ;;  %1204 = vst [vmem:[%s1957_s28 + $0x58] sm:$0xff] (!%p1391_p7), %v1188_v35 }
 0x265   : > { %v1462_v7 = vpop.f32.mrb[31].mxu1 }
 0x266   : > { %v1132_v8 = vadd.f32 %v1460_v3, %v875_v62  ;;  %v1463_v9 = vadd.f32 %v1462_v7, %v1461_v4 }
 0x267   : > { %v1166_v33 = vld [vmem:[%s1957_s28 + $0x60] sm:$0xff] (!%p1391_p7) }
 0x268   : > { %1148 = vst [vmem:[%s1957_s28 + $0x70] sm:$0xff] %v1132_v8  ;;  %v1133_v10 = vadd.f32 %v1463_v9, %v876_v6  ;;  %v1189_v38 = vadd.f32 (!%p1391_p7), %v1392_v12, %v1166_v33 }
 0x269   : > { %v1167_v34 = vld [vmem:[%s1957_s28 + $0x68] sm:$0xff] (!%p1391_p7) }
 0x26a   : > { %1149 = vst [vmem:[%s1957_s28 + $0x78] sm:$0xff] %v1133_v10  ;;  %v1190_v39 = vadd.f32 (!%p1391_p7), %v1392_v12, %v1167_v34  ;;  %1205 = vst [vmem:[%s1957_s28 + $0x60] sm:$0xff] (!%p1391_p7), %v1189_v38 }
 0x26c   : > { %1206 = vst [vmem:[%s1957_s28 + $0x68] sm:$0xff] %v1190_v39 }
 0x26f   : > { %v1168_v40 = vld [vmem:[%s1957_s28 + $0x70] sm:$0xff] }
 0x270   : > { %v1191_v43 = vadd.f32 %v1392_v12, %v1168_v40 }
 0x271   : > { %v1169_v42 = vld [vmem:[%s1957_s28 + $0x78] sm:$0xff] }
 0x272   : > { %v1192_v44 = vadd.f32 %v1392_v12, %v1169_v42  ;;  %1207 = vst [vmem:[%s1957_s28 + $0x70] sm:$0xff] %v1191_v43 }
 0x274   : > { %1208 = vst [vmem:[%s1957_s28 + $0x78] sm:$0xff] %v1192_v44 }
 0x275 PF: > { %s1399_s23 = sshll.u32 %s1765_s24, 11  ;;  %s1223_s12 = sshll.u32 %s1957_s28, 4  ;;  %s2188_s12 = int_to_ptr.vmem [resolvable:$true] %s1223_s12 }
 0x276   : > { %s2185_s11 = scalar_lea.hbm %s2255_s5, %s1399_s23  ;;  %s2273_s16 = sand.u32 1, %s1745_s19  }
 0x277   : > { %s2192_s17 = scalar_lea.sflag [#allocation4], %s2273_s16  ;;  %s1667_s7 = scalar_lea.vmem %s2188_s12, 2048 }
 0x278   : > { %p1668_p8 = scmp.ne.s32.totalorder %s2188_s12, %s1667_s7  ;;  %s1781_s24 = smov [#allocation3]  }
 0x279   : > { %s1671_s8 = sshll.u32 %s1781_s24, 4  ;;  %s1672_s8 = int_to_ptr.vmem [resolvable:$false] %s1671_s8 }
 0x27a   : > { %p1669_p9 = pnand %p1668_p8, %p1893_p10  ;;  %s1673_s29 = scalar_lea.vmem %s1672_s8, 4096 }
 0x27b   : > { %p1674_p13 = scmp.lt.s32.totalorder %s2188_s12, %s1672_s8  ;;  %p1675_p0 = scmp.lt.s32.totalorder %s1673_s29, %s1667_s7 }
 0x27c   : > { %p1670_p11 = pneg %p1669_p9 }
 0x27d   : > { %p1676_p1 = por %p1675_p0, %p1674_p13 }
 0x27f   : > { %p1677_p2 = pnand %p1676_p1, %p1670_p11 }
 0x281   : > { %1680 = shalt.err (!%p1677_p2)
}
 0x282   : > { %s1681_s9 = scalar_lea.hbm %s2185_s11, 2048  ;;  %s1685_s28 = scalar_lea.hbm %s2255_s5, 4096 }
 0x283   : > { %p1682_p3 = scmp.ne.s32.totalorder %s2185_s11, %s1681_s9  ;;  %p1686_p6 = scmp.lt.u32.totalorder %s2185_s11, %s2255_s5 }
 0x284   : > { %p1687_p7 = scmp.lt.u32.totalorder %s1685_s28, %s1681_s9  ;;  %p1689_p9 = scmp.lt.u32.totalorder %s1681_s9, %s2185_s11 }
 0x285   : > { %p1683_p4 = pnand %p1682_p3, %p1893_p10 }
 0x286   : > { %p1688_p8 = por %p1687_p7, %p1686_p6 }
 0x287   : > { %p1684_p5 = pneg %p1683_p4 }
 0x288   : > { %p1690_p11 = por %p1689_p9, %p1688_p8 }
 0x28a   : > { %p1691_p13 = pnand %p1690_p11, %p1684_p5 }
 0x28c   : > { %1694 = shalt.err (!%p1691_p13)
}
 0x28d   : > { %s1782_s25 = smov 128   ;;  %s1783_s26 = smov 8  }
 0x28e   : > { %1464 = dma.vmem_to_hbm [thread:$0]  (%p1893_p10), %s2188_s12, 2048, %s2185_s11, %s2192_s17, %s1782_s25, %s1782_s25, %s1783_s26  }
 0x28f PF: > { %p1470_p0 = scmp.ge.s32.totalorder %s1777_s27, 2  ;;  %s1238_s23 = sand.u32 1, %s1741_s18  }
 0x290   : > { %s1239_s30 = scalar_lea.sflag [#allocation4], %s1238_s23 }
 0x291   : > { %p1467_p1 = pnand %p1470_p0, %p1900_p12 }
 0x293   : > { %1736 = dma.done.wait (!%p1467_p1), %s1239_s30, 2048  }
 0x294   : > { %1738 = vsyncadd (!%p1467_p1), %s1239_s30, 4294965248  ;;  %s18_s27 = sadd.s32 1, %s1777_s27   ;;  %s2274_s21 = sld [smem:[#allocation6_spill]] }
 0x295   : > { %p15_p2 = scmp.ge.s32.totalorder %s18_s27, 6   ;;  %s2275_s22 = sld [smem:[#allocation11_spill]] }
 0x296   : > { %s2276_s23 = sld [smem:[#allocation7_spill]]  ;;  %s2277_s24 = sld [smem:[#allocation8_spill]] }
 0x297   : > { %s2278_s25 = sld [smem:[#allocation9_spill]]  ;;  %s2279_s26 = sld [smem:[#allocation10_spill]] }
 0x298   : > { %s2280_s18 = smov %s1745_s19  ;;  %s2281_s19 = smov %s1749_s20 }
 0x299   : > { %s2282_s20 = smov %s1898_s14  ;;  %17 = sbr.rel (!%p15_p2) target bundleno = 8 (0x8), region = 135 }
 0x2a0   :  { %1244 = vsyncpa [#allocation4], 1 }
 0x2a1   :  { %1246 = vsyncpa [#allocation4 + $0x1], 1 }

</bundles_post_ra>
